<compile_context>
chip_gen: v5e
topology: v5e:2x2
jax: 0.10.0
libtpu: 0.0.40
codegen_flags: <defaults>
</compile_context>

<pallas_src>
import functools
import math

import jax
import jax.numpy as jnp
import numpy as np
from jax.experimental import pallas as pl
from jax.experimental.pallas import tpu as pltpu


def _star_layer_kernel(
    x_ref, e_ref, r_ref,
    wq_ref, bq_ref, wk_ref, bk_ref, wv_ref, bv_ref, wo_ref, bo_ref,
    w1_ref, b1_ref, w2_ref, b2_ref,
    ln1w_ref, ln1b_ref, ln2w_ref, ln2b_ref, g_ref,
    out_src_ref, out_rly_ref,
    *, inv_denom, eps,
):
    f32 = jnp.float32
    bf16 = jnp.bfloat16

    x = x_ref[...]                       # [L, D] satellites of this batch
    e = e_ref[...]                       # [L, D] embeddings
    r = r_ref[...]                       # [1, D] relay node
    L, D = x.shape
    G = g_ref[...]                       # [D, D] bf16 block-diagonal head sum+broadcast

    def mm(a, w_ref):                    # bf16 operands, f32 accumulate (MXU)
        return jnp.dot(a.astype(bf16), w_ref[...], preferred_element_type=f32)

    def proj(a, w_ref, b_ref):
        return mm(a, w_ref) + b_ref[...]

    # ---- fused K/V projections of x ++ emb ++ relay; Q projection of x ----
    xer = jnp.concatenate([x, e, r], axis=0)            # [2L+1, D]
    k_all = proj(xer, wk_ref, bk_ref)
    v_all = proj(xer, wv_ref, bv_ref)
    k, k_e, k_r = k_all[:L], k_all[L:2 * L], k_all[2 * L:]
    v, v_e, v_r = v_all[:L], v_all[L:2 * L], v_all[2 * L:]
    q = proj(x, wq_ref, bq_ref) * inv_denom             # fold 1/sqrt(kdim) into q once

    # ---- ring window: zero-padded shift by +-1 position (nn.Unfold semantics) ----
    zrow = jnp.zeros((1, D), f32)
    k_prev = jnp.concatenate([zrow, k[:L - 1]], axis=0)
    k_next = jnp.concatenate([k[1:], zrow], axis=0)
    v_prev = jnp.concatenate([zrow, v[:L - 1]], axis=0)
    v_next = jnp.concatenate([v[1:], zrow], axis=0)

    # ---- ring attention over {prev, self, next, emb, relay}, per head ----
    # G sums q*k within each head's kdim lanes and broadcasts the sum back across them,
    # so every intermediate stays lane-dense [L, D] (no [N, H] masked stores).
    def head_logits(key):                                # key: [L, D] or [1, D] (broadcasts)
        return jnp.dot((q * key).astype(bf16), G, preferred_element_type=f32)

    l0 = head_logits(k_prev); l1 = head_logits(k); l2 = head_logits(k_next)
    l3 = head_logits(k_e);    l4 = head_logits(k_r)
    m = jnp.maximum(jnp.maximum(jnp.maximum(l0, l1), jnp.maximum(l2, l3)), l4)
    e0 = jnp.exp(l0 - m); e1 = jnp.exp(l1 - m); e2 = jnp.exp(l2 - m)
    e3 = jnp.exp(l3 - m); e4 = jnp.exp(l4 - m)
    inv_z = pl.reciprocal(e0 + e1 + e2 + e3 + e4, approx=True)
    ring = (e0 * v_prev + e1 * v + e2 * v_next + e3 * v_e + e4 * v_r) * inv_z   # [L, D]

    # ---- star attention: query = raw relay (as in the reference), keys = k(x) ++ k(relay) ----
    r_s = r * inv_denom
    slog_x = jax.lax.dot_general(r_s.astype(bf16), k.astype(bf16),
                                 (((1,), (1,)), ((), ())),
                                 preferred_element_type=f32)          # [1, L]
    slog_r = jnp.sum(r_s * k_r, axis=1, keepdims=True)                # [1, 1]
    sm = jnp.maximum(jnp.max(slog_x, axis=1, keepdims=True), slog_r)
    ex = jnp.exp(slog_x - sm)
    er = jnp.exp(slog_r - sm)
    inv_zs = pl.reciprocal(jnp.sum(ex, axis=1, keepdims=True) + er, approx=True)
    star = (jnp.dot(ex.astype(bf16), v.astype(bf16), preferred_element_type=f32)
            + er * v_r) * inv_zs                                       # [1, D]

    # ---- shared tail: o_proj, residual, LN, FFN, residual, LN on [L+1, D] ----
    att = jnp.concatenate([ring, star], axis=0)          # [L+1, D]
    resid = jnp.concatenate([x, r], axis=0)              # [L+1, D]
    h = resid + proj(att, wo_ref, bo_ref)

    def layer_norm(zv, w_ref, b_ref):
        mu = jnp.mean(zv, axis=1, keepdims=True)
        zc = zv - mu
        var = jnp.mean(zc * zc, axis=1, keepdims=True)
        return zc * jax.lax.rsqrt(var + eps) * w_ref[...] + b_ref[...]

    h = layer_norm(h, ln1w_ref, ln1b_ref)
    f = jnp.maximum(proj(h, w1_ref, b1_ref), 0.0)        # relu
    f = proj(f, w2_ref, b2_ref)
    out = layer_norm(h + f, ln2w_ref, ln2b_ref)

    out_src_ref[...] = out[:L]
    out_rly_ref[...] = out[L:]


def init_params(key, embed_dim, dim_feedforward):
    def linear(k, fan_in, fan_out):
        kw, kb = jax.random.split(k)
        bound = 1.0 / math.sqrt(fan_in)
        w = jax.random.uniform(kw, (fan_in, fan_out), jnp.float32, -bound, bound)
        b = jax.random.uniform(kb, (1, fan_out), jnp.float32, -bound, bound)
        return w, b

    keys = jax.random.split(key, 6)
    wq, bq = linear(keys[0], embed_dim, embed_dim)
    wk, bk = linear(keys[1], embed_dim, embed_dim)
    wv, bv = linear(keys[2], embed_dim, embed_dim)
    wo, bo = linear(keys[3], embed_dim, embed_dim)
    w1, b1 = linear(keys[4], embed_dim, dim_feedforward)
    w2, b2 = linear(keys[5], dim_feedforward, embed_dim)
    ln1w = jnp.ones((1, embed_dim), jnp.float32)
    ln1b = jnp.zeros((1, embed_dim), jnp.float32)
    ln2w = jnp.ones((1, embed_dim), jnp.float32)
    ln2b = jnp.zeros((1, embed_dim), jnp.float32)
    return dict(wq=wq, bq=bq, wk=wk, bk=bk, wv=wv, bv=bv, wo=wo, bo=bo,
                w1=w1, b1=b1, w2=w2, b2=b2,
                ln1w=ln1w, ln1b=ln1b, ln2w=ln2w, ln2b=ln2b)


def star_transformer_layer(src, emb, rly, params, *, nhead):
    L, B, D = src.shape
    assert emb.shape == (L, B, D) and rly.shape == (1, B, D)
    assert D % nhead == 0 and L >= 2
    kdim = D // nhead
    inv_denom = 1.0 / math.sqrt(kdim)
    f32, bf16 = jnp.float32, jnp.bfloat16

    # [L, B, D] -> [B, L, D]; one batch per grid step.
    x = jnp.transpose(src.astype(f32), (1, 0, 2))
    e = jnp.transpose(emb.astype(f32), (1, 0, 2))
    r = jnp.transpose(rly.astype(f32), (1, 0, 2))        # [B, 1, D]

    head_id = jnp.arange(D) // kdim
    G = (head_id[:, None] == head_id[None, :]).astype(bf16)   # [D, D] per-head sum+broadcast

    p = params
    weights = (
        p["wq"].astype(bf16), p["bq"], p["wk"].astype(bf16), p["bk"],
        p["wv"].astype(bf16), p["bv"], p["wo"].astype(bf16), p["bo"],
        p["w1"].astype(bf16), p["b1"], p["w2"].astype(bf16), p["b2"],
        p["ln1w"], p["ln1b"], p["ln2w"], p["ln2b"], G,
    )

    def pinned(a):   # full-array block, same block every step -> stays VMEM-resident
        return pl.BlockSpec(a.shape, lambda b: (0, 0))

    in_specs = (
        [pl.BlockSpec((None, L, D), lambda b: (b, 0, 0)),
         pl.BlockSpec((None, L, D), lambda b: (b, 0, 0)),
         pl.BlockSpec((None, 1, D), lambda b: (b, 0, 0))]
        + [pinned(w) for w in weights]
    )
    out_specs = (
        pl.BlockSpec((None, L, D), lambda b: (b, 0, 0)),
        pl.BlockSpec((None, 1, D), lambda b: (b, 0, 0)),
    )

    kernel = functools.partial(_star_layer_kernel, inv_denom=inv_denom, eps=1e-5)
    out_src, out_rly = pl.pallas_call(
        kernel,
        grid=(B,),
        in_specs=in_specs,
        out_specs=out_specs,
        out_shape=(jax.ShapeDtypeStruct((B, L, D), f32),
                   jax.ShapeDtypeStruct((B, 1, D), f32)),
        compiler_params=pltpu.CompilerParams(
            dimension_semantics=("parallel",),
            vmem_limit_bytes=32 * 1024 * 1024),
    )(x, e, r, *weights)

    return jnp.transpose(out_src, (1, 0, 2)), jnp.transpose(out_rly, (1, 0, 2))


def _reference_forward(src, emb, rly, p, nhead):
    """Pure-JAX (f32) mirror of the PyTorch StarTransformerLayer forward."""
    L, B, D = src.shape
    kdim = D // nhead
    denom = math.sqrt(kdim)

    def lin(z, w, b):
        return jnp.dot(z, w) + b

    q = lin(src, p["wq"], p["bq"]); k = lin(src, p["wk"], p["bk"]); v = lin(src, p["wv"], p["bv"])
    k_e = lin(emb, p["wk"], p["bk"]); v_e = lin(emb, p["wv"], p["bv"])
    k_r = lin(rly, p["wk"], p["bk"]); v_r = lin(rly, p["wv"], p["bv"])          # [1, B, D]

    zpad = jnp.zeros((1, B, D), src.dtype)
    k_prev = jnp.concatenate([zpad, k[:-1]], axis=0)
    k_next = jnp.concatenate([k[1:], zpad], axis=0)
    v_prev = jnp.concatenate([zpad, v[:-1]], axis=0)
    v_next = jnp.concatenate([v[1:], zpad], axis=0)

    def heads(z):
        return z.reshape(z.shape[:-1] + (nhead, kdim))

    qh = heads(q)
    keys = jnp.stack([heads(k_prev), heads(k), heads(k_next), heads(k_e),
                      jnp.broadcast_to(heads(k_r), (L, B, nhead, kdim))], axis=0)
    vals = jnp.stack([heads(v_prev), heads(v), heads(v_next), heads(v_e),
                      jnp.broadcast_to(heads(v_r), (L, B, nhead, kdim))], axis=0)
    logits = jnp.einsum("lbhd,jlbhd->jlbh", qh, keys) / denom
    alpha = jax.nn.softmax(logits, axis=0)
    ring = jnp.einsum("jlbh,jlbhd->lbhd", alpha, vals).reshape(L, B, D)

    kk = jnp.concatenate([k, k_r], axis=0)           # [L+1, B, D]
    vv = jnp.concatenate([v, v_r], axis=0)
    slog = jnp.einsum("obd,lbd->obl", rly, kk) / denom
    sw = jax.nn.softmax(slog, axis=-1)
    star = jnp.einsum("obl,lbd->obd", sw, vv)        # [1, B, D]

    src2 = lin(ring, p["wo"], p["bo"])
    rly2 = lin(star, p["wo"], p["bo"])
    h = jnp.concatenate([src, rly], axis=0) + jnp.concatenate([src2, rly2], axis=0)

    def layer_norm(z, w_, b_):
        mu = z.mean(-1, keepdims=True)
        zc = z - mu
        var = (zc * zc).mean(-1, keepdims=True)
        return zc / jnp.sqrt(var + 1e-5) * w_ + b_

    h = layer_norm(h, p["ln1w"], p["ln1b"])
    f = jnp.maximum(lin(h, p["w1"], p["b1"]), 0.0)
    f = lin(f, p["w2"], p["b2"])
    out = layer_norm(h + f, p["ln2w"], p["ln2b"])
    return out[:L], out[L:]


if __name__ == "__main__":
    L, B, D, NHEAD, DFF = 8, 2, 32, 4, 64
    key = jax.random.PRNGKey(0)
    k_src, k_emb, k_rly, k_par = jax.random.split(key, 4)
    src = jax.random.normal(k_src, (L, B, D), jnp.float32)
    emb = jax.random.normal(k_emb, (L, B, D), jnp.float32)
    rly = jax.random.normal(k_rly, (1, B, D), jnp.float32)
    params = init_params(k_par, D, DFF)

    fwd = jax.jit(functools.partial(star_transformer_layer, nhead=NHEAD))
    out_src, out_rly = fwd(src, emb, rly, params)
    jax.block_until_ready((out_src, out_rly))
    assert out_src.shape == (L, B, D) and out_rly.shape == (1, B, D)

    # correctness: compare against a pure-JAX f32 reference of the PyTorch forward
    # (kernel uses bf16 MXU operands + approx reciprocal, hence the loose tolerance)
    ref_src, ref_rly = _reference_forward(src, emb, rly, params, NHEAD)
    np.testing.assert_allclose(np.asarray(out_src), np.asarray(ref_src), atol=0.1, rtol=0.0)
    np.testing.assert_allclose(np.asarray(out_rly), np.asarray(ref_rly), atol=0.1, rtol=0.0)

    print("KERNEL_OK")
</pallas_src>

<mosaic_0001>
module attributes {stable_mosaic.version = 11 : i64} {
  func.func @_star_layer_kernel(%arg0: i32, %arg1: memref<1x8x32xf32, #tpu.memory_space<vmem>>, %arg2: memref<1x8x32xf32, #tpu.memory_space<vmem>>, %arg3: memref<1x1x32xf32, #tpu.memory_space<vmem>>, %arg4: memref<32x32xbf16, #tpu.memory_space<vmem>>, %arg5: memref<1x32xf32, #tpu.memory_space<vmem>>, %arg6: memref<32x32xbf16, #tpu.memory_space<vmem>>, %arg7: memref<1x32xf32, #tpu.memory_space<vmem>>, %arg8: memref<32x32xbf16, #tpu.memory_space<vmem>>, %arg9: memref<1x32xf32, #tpu.memory_space<vmem>>, %arg10: memref<32x32xbf16, #tpu.memory_space<vmem>>, %arg11: memref<1x32xf32, #tpu.memory_space<vmem>>, %arg12: memref<32x64xbf16, #tpu.memory_space<vmem>>, %arg13: memref<1x64xf32, #tpu.memory_space<vmem>>, %arg14: memref<64x32xbf16, #tpu.memory_space<vmem>>, %arg15: memref<1x32xf32, #tpu.memory_space<vmem>>, %arg16: memref<1x32xf32, #tpu.memory_space<vmem>>, %arg17: memref<1x32xf32, #tpu.memory_space<vmem>>, %arg18: memref<1x32xf32, #tpu.memory_space<vmem>>, %arg19: memref<1x32xf32, #tpu.memory_space<vmem>>, %arg20: memref<32x32xbf16, #tpu.memory_space<vmem>>, %arg21: memref<1x8x32xf32, #tpu.memory_space<vmem>>, %arg22: memref<1x1x32xf32, #tpu.memory_space<vmem>>) attributes {dimension_semantics = [#tpu.dimension_semantics<parallel>], iteration_bounds = array<i64: 2>, scalar_prefetch = 0 : i64, scratch_operands = 0 : i64, tpu.core_type = #tpu.core_type<tc>, window_params = [{transform_indices = @transform_0, window_bounds = array<i64: 1, 8, 32>}, {transform_indices = @transform_1, window_bounds = array<i64: 1, 8, 32>}, {transform_indices = @transform_2, window_bounds = array<i64: 1, 1, 32>}, {pipeline_mode = #tpu.pipeline_mode<synchronous>, transform_indices = @transform_3, window_bounds = array<i64: 32, 32>}, {pipeline_mode = #tpu.pipeline_mode<synchronous>, transform_indices = @transform_4, window_bounds = array<i64: 1, 32>}, {pipeline_mode = #tpu.pipeline_mode<synchronous>, transform_indices = @transform_5, window_bounds = array<i64: 32, 32>}, {pipeline_mode = #tpu.pipeline_mode<synchronous>, transform_indices = @transform_6, window_bounds = array<i64: 1, 32>}, {pipeline_mode = #tpu.pipeline_mode<synchronous>, transform_indices = @transform_7, window_bounds = array<i64: 32, 32>}, {pipeline_mode = #tpu.pipeline_mode<synchronous>, transform_indices = @transform_8, window_bounds = array<i64: 1, 32>}, {pipeline_mode = #tpu.pipeline_mode<synchronous>, transform_indices = @transform_9, window_bounds = array<i64: 32, 32>}, {pipeline_mode = #tpu.pipeline_mode<synchronous>, transform_indices = @transform_10, window_bounds = array<i64: 1, 32>}, {pipeline_mode = #tpu.pipeline_mode<synchronous>, transform_indices = @transform_11, window_bounds = array<i64: 32, 64>}, {pipeline_mode = #tpu.pipeline_mode<synchronous>, transform_indices = @transform_12, window_bounds = array<i64: 1, 64>}, {pipeline_mode = #tpu.pipeline_mode<synchronous>, transform_indices = @transform_13, window_bounds = array<i64: 64, 32>}, {pipeline_mode = #tpu.pipeline_mode<synchronous>, transform_indices = @transform_14, window_bounds = array<i64: 1, 32>}, {pipeline_mode = #tpu.pipeline_mode<synchronous>, transform_indices = @transform_15, window_bounds = array<i64: 1, 32>}, {pipeline_mode = #tpu.pipeline_mode<synchronous>, transform_indices = @transform_16, window_bounds = array<i64: 1, 32>}, {pipeline_mode = #tpu.pipeline_mode<synchronous>, transform_indices = @transform_17, window_bounds = array<i64: 1, 32>}, {pipeline_mode = #tpu.pipeline_mode<synchronous>, transform_indices = @transform_18, window_bounds = array<i64: 1, 32>}, {pipeline_mode = #tpu.pipeline_mode<synchronous>, transform_indices = @transform_19, window_bounds = array<i64: 32, 32>}, {transform_indices = @transform_20, window_bounds = array<i64: 1, 8, 32>}, {transform_indices = @transform_21, window_bounds = array<i64: 1, 1, 32>}]} {
    %c0 = arith.constant 0 : index
    %c0_0 = arith.constant 0 : index
    %c0_1 = arith.constant 0 : index
    %0 = vector.load %arg1[%c0, %c0_0, %c0_1] : memref<1x8x32xf32, #tpu.memory_space<vmem>>, vector<1x8x32xf32>
    %1 = vector.shape_cast %0 : vector<1x8x32xf32> to vector<8x32xf32>
    %c0_2 = arith.constant 0 : index
    %c0_3 = arith.constant 0 : index
    %c0_4 = arith.constant 0 : index
    %2 = vector.load %arg2[%c0_2, %c0_3, %c0_4] : memref<1x8x32xf32, #tpu.memory_space<vmem>>, vector<1x8x32xf32>
    %3 = vector.shape_cast %2 : vector<1x8x32xf32> to vector<8x32xf32>
    %c0_5 = arith.constant 0 : index
    %c0_6 = arith.constant 0 : index
    %c0_7 = arith.constant 0 : index
    %4 = vector.load %arg3[%c0_5, %c0_6, %c0_7] : memref<1x1x32xf32, #tpu.memory_space<vmem>>, vector<1x1x32xf32>
    %5 = vector.shape_cast %4 : vector<1x1x32xf32> to vector<1x32xf32>
    %c0_8 = arith.constant 0 : index
    %c0_9 = arith.constant 0 : index
    %6 = vector.load %arg20[%c0_8, %c0_9] : memref<32x32xbf16, #tpu.memory_space<vmem>>, vector<32x32xbf16>
    %7 = tpu.concatenate %1, %3, %5 in 0 : vector<8x32xf32>, vector<8x32xf32>, vector<1x32xf32> -> vector<17x32xf32>
    %8 = arith.truncf %7 : vector<17x32xf32> to vector<17x32xbf16>
    %c0_10 = arith.constant 0 : index
    %c0_11 = arith.constant 0 : index
    %9 = vector.load %arg6[%c0_10, %c0_11] : memref<32x32xbf16, #tpu.memory_space<vmem>>, vector<32x32xbf16>
    %cst = arith.constant dense<0.000000e+00> : vector<17x32xf32>
    %10 = tpu.matmul %8, %9, %cst {dimension_numbers = #tpu.dot_dimension_numbers<[1], [0], [0], [1], [0, 0, 1, 1], [], []>} : vector<17x32xbf16>, vector<32x32xbf16>, vector<17x32xf32> -> vector<17x32xf32>
    %c0_12 = arith.constant 0 : index
    %c0_13 = arith.constant 0 : index
    %11 = vector.load %arg7[%c0_12, %c0_13] : memref<1x32xf32, #tpu.memory_space<vmem>>, vector<1x32xf32>
    %12 = vector.broadcast %11 : vector<1x32xf32> to vector<17x32xf32>
    %13 = arith.addf %10, %12 : vector<17x32xf32>
    %14 = arith.truncf %7 : vector<17x32xf32> to vector<17x32xbf16>
    %c0_14 = arith.constant 0 : index
    %c0_15 = arith.constant 0 : index
    %15 = vector.load %arg8[%c0_14, %c0_15] : memref<32x32xbf16, #tpu.memory_space<vmem>>, vector<32x32xbf16>
    %cst_16 = arith.constant dense<0.000000e+00> : vector<17x32xf32>
    %16 = tpu.matmul %14, %15, %cst_16 {dimension_numbers = #tpu.dot_dimension_numbers<[1], [0], [0], [1], [0, 0, 1, 1], [], []>} : vector<17x32xbf16>, vector<32x32xbf16>, vector<17x32xf32> -> vector<17x32xf32>
    %c0_17 = arith.constant 0 : index
    %c0_18 = arith.constant 0 : index
    %17 = vector.load %arg9[%c0_17, %c0_18] : memref<1x32xf32, #tpu.memory_space<vmem>>, vector<1x32xf32>
    %18 = vector.broadcast %17 : vector<1x32xf32> to vector<17x32xf32>
    %19 = arith.addf %16, %18 : vector<17x32xf32>
    %20 = vector.extract_strided_slice %13 {offsets = [0, 0], sizes = [8, 32], strides = [1, 1]} : vector<17x32xf32> to vector<8x32xf32>
    %21 = vector.extract_strided_slice %13 {offsets = [8, 0], sizes = [8, 32], strides = [1, 1]} : vector<17x32xf32> to vector<8x32xf32>
    %22 = vector.extract_strided_slice %13 {offsets = [16, 0], sizes = [1, 32], strides = [1, 1]} : vector<17x32xf32> to vector<1x32xf32>
    %23 = vector.extract_strided_slice %19 {offsets = [0, 0], sizes = [8, 32], strides = [1, 1]} : vector<17x32xf32> to vector<8x32xf32>
    %24 = vector.extract_strided_slice %19 {offsets = [8, 0], sizes = [8, 32], strides = [1, 1]} : vector<17x32xf32> to vector<8x32xf32>
    %25 = vector.extract_strided_slice %19 {offsets = [16, 0], sizes = [1, 32], strides = [1, 1]} : vector<17x32xf32> to vector<1x32xf32>
    %26 = arith.truncf %1 : vector<8x32xf32> to vector<8x32xbf16>
    %c0_19 = arith.constant 0 : index
    %c0_20 = arith.constant 0 : index
    %27 = vector.load %arg4[%c0_19, %c0_20] : memref<32x32xbf16, #tpu.memory_space<vmem>>, vector<32x32xbf16>
    %cst_21 = arith.constant dense<0.000000e+00> : vector<8x32xf32>
    %28 = tpu.matmul %26, %27, %cst_21 {dimension_numbers = #tpu.dot_dimension_numbers<[1], [0], [0], [1], [0, 0, 1, 1], [], []>} : vector<8x32xbf16>, vector<32x32xbf16>, vector<8x32xf32> -> vector<8x32xf32>
    %c0_22 = arith.constant 0 : index
    %c0_23 = arith.constant 0 : index
    %29 = vector.load %arg5[%c0_22, %c0_23] : memref<1x32xf32, #tpu.memory_space<vmem>>, vector<1x32xf32>
    %30 = vector.broadcast %29 : vector<1x32xf32> to vector<8x32xf32>
    %31 = arith.addf %28, %30 : vector<8x32xf32>
    %cst_24 = arith.constant 0.353553385 : f32
    %32 = vector.broadcast %cst_24 : f32 to vector<8x32xf32>
    %33 = arith.mulf %31, %32 : vector<8x32xf32>
    %cst_25 = arith.constant 0.000000e+00 : f32
    %34 = vector.broadcast %cst_25 : f32 to vector<1x32xf32>
    %35 = vector.extract_strided_slice %20 {offsets = [0, 0], sizes = [7, 32], strides = [1, 1]} : vector<8x32xf32> to vector<7x32xf32>
    %36 = tpu.concatenate %34, %35 in 0 : vector<1x32xf32>, vector<7x32xf32> -> vector<8x32xf32>
    %37 = vector.extract_strided_slice %20 {offsets = [1, 0], sizes = [7, 32], strides = [1, 1]} : vector<8x32xf32> to vector<7x32xf32>
    %38 = tpu.concatenate %37, %34 in 0 : vector<7x32xf32>, vector<1x32xf32> -> vector<8x32xf32>
    %39 = vector.extract_strided_slice %23 {offsets = [0, 0], sizes = [7, 32], strides = [1, 1]} : vector<8x32xf32> to vector<7x32xf32>
    %40 = tpu.concatenate %34, %39 in 0 : vector<1x32xf32>, vector<7x32xf32> -> vector<8x32xf32>
    %41 = vector.extract_strided_slice %23 {offsets = [1, 0], sizes = [7, 32], strides = [1, 1]} : vector<8x32xf32> to vector<7x32xf32>
    %42 = tpu.concatenate %41, %34 in 0 : vector<7x32xf32>, vector<1x32xf32> -> vector<8x32xf32>
    %43 = arith.mulf %33, %36 : vector<8x32xf32>
    %44 = arith.truncf %43 : vector<8x32xf32> to vector<8x32xbf16>
    %cst_26 = arith.constant dense<0.000000e+00> : vector<8x32xf32>
    %45 = tpu.matmul %44, %6, %cst_26 {dimension_numbers = #tpu.dot_dimension_numbers<[1], [0], [0], [1], [0, 0, 1, 1], [], []>} : vector<8x32xbf16>, vector<32x32xbf16>, vector<8x32xf32> -> vector<8x32xf32>
    %46 = arith.mulf %33, %20 : vector<8x32xf32>
    %47 = arith.truncf %46 : vector<8x32xf32> to vector<8x32xbf16>
    %cst_27 = arith.constant dense<0.000000e+00> : vector<8x32xf32>
    %48 = tpu.matmul %47, %6, %cst_27 {dimension_numbers = #tpu.dot_dimension_numbers<[1], [0], [0], [1], [0, 0, 1, 1], [], []>} : vector<8x32xbf16>, vector<32x32xbf16>, vector<8x32xf32> -> vector<8x32xf32>
    %49 = arith.mulf %33, %38 : vector<8x32xf32>
    %50 = arith.truncf %49 : vector<8x32xf32> to vector<8x32xbf16>
    %cst_28 = arith.constant dense<0.000000e+00> : vector<8x32xf32>
    %51 = tpu.matmul %50, %6, %cst_28 {dimension_numbers = #tpu.dot_dimension_numbers<[1], [0], [0], [1], [0, 0, 1, 1], [], []>} : vector<8x32xbf16>, vector<32x32xbf16>, vector<8x32xf32> -> vector<8x32xf32>
    %52 = arith.mulf %33, %21 : vector<8x32xf32>
    %53 = arith.truncf %52 : vector<8x32xf32> to vector<8x32xbf16>
    %cst_29 = arith.constant dense<0.000000e+00> : vector<8x32xf32>
    %54 = tpu.matmul %53, %6, %cst_29 {dimension_numbers = #tpu.dot_dimension_numbers<[1], [0], [0], [1], [0, 0, 1, 1], [], []>} : vector<8x32xbf16>, vector<32x32xbf16>, vector<8x32xf32> -> vector<8x32xf32>
    %55 = vector.broadcast %22 : vector<1x32xf32> to vector<8x32xf32>
    %56 = arith.mulf %33, %55 : vector<8x32xf32>
    %57 = arith.truncf %56 : vector<8x32xf32> to vector<8x32xbf16>
    %cst_30 = arith.constant dense<0.000000e+00> : vector<8x32xf32>
    %58 = tpu.matmul %57, %6, %cst_30 {dimension_numbers = #tpu.dot_dimension_numbers<[1], [0], [0], [1], [0, 0, 1, 1], [], []>} : vector<8x32xbf16>, vector<32x32xbf16>, vector<8x32xf32> -> vector<8x32xf32>
    %59 = arith.maximumf %45, %48 : vector<8x32xf32>
    %60 = arith.maximumf %51, %54 : vector<8x32xf32>
    %61 = arith.maximumf %59, %60 : vector<8x32xf32>
    %62 = arith.maximumf %61, %58 : vector<8x32xf32>
    %63 = arith.subf %45, %62 : vector<8x32xf32>
    %64 = math.exp %63 : vector<8x32xf32>
    %65 = arith.subf %48, %62 : vector<8x32xf32>
    %66 = math.exp %65 : vector<8x32xf32>
    %67 = arith.subf %51, %62 : vector<8x32xf32>
    %68 = math.exp %67 : vector<8x32xf32>
    %69 = arith.subf %54, %62 : vector<8x32xf32>
    %70 = math.exp %69 : vector<8x32xf32>
    %71 = arith.subf %58, %62 : vector<8x32xf32>
    %72 = math.exp %71 : vector<8x32xf32>
    %73 = arith.addf %64, %66 : vector<8x32xf32>
    %74 = arith.addf %73, %68 : vector<8x32xf32>
    %75 = arith.addf %74, %70 : vector<8x32xf32>
    %76 = arith.addf %75, %72 : vector<8x32xf32>
    %77 = tpu.reciprocal %76 {approx = true} : vector<8x32xf32> -> vector<8x32xf32>
    %78 = arith.mulf %64, %40 : vector<8x32xf32>
    %79 = arith.mulf %66, %23 : vector<8x32xf32>
    %80 = arith.addf %78, %79 : vector<8x32xf32>
    %81 = arith.mulf %68, %42 : vector<8x32xf32>
    %82 = arith.addf %80, %81 : vector<8x32xf32>
    %83 = arith.mulf %70, %24 : vector<8x32xf32>
    %84 = arith.addf %82, %83 : vector<8x32xf32>
    %85 = vector.broadcast %25 : vector<1x32xf32> to vector<8x32xf32>
    %86 = arith.mulf %72, %85 : vector<8x32xf32>
    %87 = arith.addf %84, %86 : vector<8x32xf32>
    %88 = arith.mulf %87, %77 : vector<8x32xf32>
    %cst_31 = arith.constant 0.353553385 : f32
    %89 = vector.broadcast %cst_31 : f32 to vector<1x32xf32>
    %90 = arith.mulf %5, %89 : vector<1x32xf32>
    %91 = arith.truncf %90 : vector<1x32xf32> to vector<1x32xbf16>
    %92 = arith.truncf %20 : vector<8x32xf32> to vector<8x32xbf16>
    %cst_32 = arith.constant dense<0.000000e+00> : vector<1x8xf32>
    %93 = tpu.matmul %91, %92, %cst_32 {dimension_numbers = #tpu.dot_dimension_numbers<[1], [1], [0], [0], [0, 0, 1, 0], [], []>} : vector<1x32xbf16>, vector<8x32xbf16>, vector<1x8xf32> -> vector<1x8xf32>
    %94 = arith.mulf %90, %22 : vector<1x32xf32>
    %cst_33 = arith.constant dense<0.000000e+00> : vector<1xf32>
    %95 = vector.multi_reduction <add>, %94, %cst_33 [1] : vector<1x32xf32> to vector<1xf32>
    %96 = vector.shape_cast %95 : vector<1xf32> to vector<1x1xf32>
    %cst_34 = arith.constant dense<0xFF800000> : vector<1xf32>
    %97 = vector.multi_reduction <maximumf>, %93, %cst_34 [1] : vector<1x8xf32> to vector<1xf32>
    %98 = vector.shape_cast %97 : vector<1xf32> to vector<1x1xf32>
    %99 = arith.maximumf %98, %96 : vector<1x1xf32>
    %100 = vector.broadcast %99 : vector<1x1xf32> to vector<1x8xf32>
    %101 = arith.subf %93, %100 : vector<1x8xf32>
    %102 = math.exp %101 : vector<1x8xf32>
    %103 = arith.subf %96, %99 : vector<1x1xf32>
    %104 = math.exp %103 : vector<1x1xf32>
    %cst_35 = arith.constant dense<0.000000e+00> : vector<1xf32>
    %105 = vector.multi_reduction <add>, %102, %cst_35 [1] : vector<1x8xf32> to vector<1xf32>
    %106 = vector.shape_cast %105 : vector<1xf32> to vector<1x1xf32>
    %107 = arith.addf %106, %104 : vector<1x1xf32>
    %108 = tpu.reciprocal %107 {approx = true} : vector<1x1xf32> -> vector<1x1xf32>
    %109 = arith.truncf %102 : vector<1x8xf32> to vector<1x8xbf16>
    %110 = arith.truncf %23 : vector<8x32xf32> to vector<8x32xbf16>
    %cst_36 = arith.constant dense<0.000000e+00> : vector<1x32xf32>
    %111 = tpu.matmul %109, %110, %cst_36 {dimension_numbers = #tpu.dot_dimension_numbers<[1], [0], [0], [1], [0, 0, 1, 1], [], []>} : vector<1x8xbf16>, vector<8x32xbf16>, vector<1x32xf32> -> vector<1x32xf32>
    %112 = vector.broadcast %104 : vector<1x1xf32> to vector<1x32xf32>
    %113 = arith.mulf %112, %25 : vector<1x32xf32>
    %114 = arith.addf %111, %113 : vector<1x32xf32>
    %115 = vector.broadcast %108 : vector<1x1xf32> to vector<1x32xf32>
    %116 = arith.mulf %114, %115 : vector<1x32xf32>
    %117 = tpu.concatenate %88, %116 in 0 : vector<8x32xf32>, vector<1x32xf32> -> vector<9x32xf32>
    %118 = tpu.concatenate %1, %5 in 0 : vector<8x32xf32>, vector<1x32xf32> -> vector<9x32xf32>
    %119 = arith.truncf %117 : vector<9x32xf32> to vector<9x32xbf16>
    %c0_37 = arith.constant 0 : index
    %c0_38 = arith.constant 0 : index
    %120 = vector.load %arg10[%c0_37, %c0_38] : memref<32x32xbf16, #tpu.memory_space<vmem>>, vector<32x32xbf16>
    %cst_39 = arith.constant dense<0.000000e+00> : vector<9x32xf32>
    %121 = tpu.matmul %119, %120, %cst_39 {dimension_numbers = #tpu.dot_dimension_numbers<[1], [0], [0], [1], [0, 0, 1, 1], [], []>} : vector<9x32xbf16>, vector<32x32xbf16>, vector<9x32xf32> -> vector<9x32xf32>
    %c0_40 = arith.constant 0 : index
    %c0_41 = arith.constant 0 : index
    %122 = vector.load %arg11[%c0_40, %c0_41] : memref<1x32xf32, #tpu.memory_space<vmem>>, vector<1x32xf32>
    %123 = vector.broadcast %122 : vector<1x32xf32> to vector<9x32xf32>
    %124 = arith.addf %121, %123 : vector<9x32xf32>
    %125 = arith.addf %118, %124 : vector<9x32xf32>
    %cst_42 = arith.constant dense<0.000000e+00> : vector<9xf32>
    %126 = vector.multi_reduction <add>, %125, %cst_42 [1] : vector<9x32xf32> to vector<9xf32>
    %127 = vector.shape_cast %126 : vector<9xf32> to vector<9x1xf32>
    %cst_43 = arith.constant 3.200000e+01 : f32
    %128 = vector.broadcast %cst_43 : f32 to vector<9x1xf32>
    %129 = arith.divf %127, %128 : vector<9x1xf32>
    %130 = vector.broadcast %129 : vector<9x1xf32> to vector<9x32xf32>
    %131 = arith.subf %125, %130 : vector<9x32xf32>
    %132 = arith.mulf %131, %131 : vector<9x32xf32>
    %cst_44 = arith.constant dense<0.000000e+00> : vector<9xf32>
    %133 = vector.multi_reduction <add>, %132, %cst_44 [1] : vector<9x32xf32> to vector<9xf32>
    %134 = vector.shape_cast %133 : vector<9xf32> to vector<9x1xf32>
    %cst_45 = arith.constant 3.200000e+01 : f32
    %135 = vector.broadcast %cst_45 : f32 to vector<9x1xf32>
    %136 = arith.divf %134, %135 : vector<9x1xf32>
    %cst_46 = arith.constant 9.99999974E-6 : f32
    %137 = vector.broadcast %cst_46 : f32 to vector<9x1xf32>
    %138 = arith.addf %136, %137 : vector<9x1xf32>
    %139 = math.rsqrt %138 : vector<9x1xf32>
    %140 = vector.broadcast %139 : vector<9x1xf32> to vector<9x32xf32>
    %141 = arith.mulf %131, %140 : vector<9x32xf32>
    %c0_47 = arith.constant 0 : index
    %c0_48 = arith.constant 0 : index
    %142 = vector.load %arg16[%c0_47, %c0_48] : memref<1x32xf32, #tpu.memory_space<vmem>>, vector<1x32xf32>
    %143 = vector.broadcast %142 : vector<1x32xf32> to vector<9x32xf32>
    %144 = arith.mulf %141, %143 : vector<9x32xf32>
    %c0_49 = arith.constant 0 : index
    %c0_50 = arith.constant 0 : index
    %145 = vector.load %arg17[%c0_49, %c0_50] : memref<1x32xf32, #tpu.memory_space<vmem>>, vector<1x32xf32>
    %146 = vector.broadcast %145 : vector<1x32xf32> to vector<9x32xf32>
    %147 = arith.addf %144, %146 : vector<9x32xf32>
    %148 = arith.truncf %147 : vector<9x32xf32> to vector<9x32xbf16>
    %c0_51 = arith.constant 0 : index
    %c0_52 = arith.constant 0 : index
    %149 = vector.load %arg12[%c0_51, %c0_52] : memref<32x64xbf16, #tpu.memory_space<vmem>>, vector<32x64xbf16>
    %cst_53 = arith.constant dense<0.000000e+00> : vector<9x64xf32>
    %150 = tpu.matmul %148, %149, %cst_53 {dimension_numbers = #tpu.dot_dimension_numbers<[1], [0], [0], [1], [0, 0, 1, 1], [], []>} : vector<9x32xbf16>, vector<32x64xbf16>, vector<9x64xf32> -> vector<9x64xf32>
    %c0_54 = arith.constant 0 : index
    %c0_55 = arith.constant 0 : index
    %151 = vector.load %arg13[%c0_54, %c0_55] : memref<1x64xf32, #tpu.memory_space<vmem>>, vector<1x64xf32>
    %152 = vector.broadcast %151 : vector<1x64xf32> to vector<9x64xf32>
    %153 = arith.addf %150, %152 : vector<9x64xf32>
    %cst_56 = arith.constant 0.000000e+00 : f32
    %154 = vector.broadcast %cst_56 : f32 to vector<9x64xf32>
    %155 = arith.maximumf %153, %154 : vector<9x64xf32>
    %156 = arith.truncf %155 : vector<9x64xf32> to vector<9x64xbf16>
    %c0_57 = arith.constant 0 : index
    %c0_58 = arith.constant 0 : index
    %157 = vector.load %arg14[%c0_57, %c0_58] : memref<64x32xbf16, #tpu.memory_space<vmem>>, vector<64x32xbf16>
    %cst_59 = arith.constant dense<0.000000e+00> : vector<9x32xf32>
    %158 = tpu.matmul %156, %157, %cst_59 {dimension_numbers = #tpu.dot_dimension_numbers<[1], [0], [0], [1], [0, 0, 1, 1], [], []>} : vector<9x64xbf16>, vector<64x32xbf16>, vector<9x32xf32> -> vector<9x32xf32>
    %c0_60 = arith.constant 0 : index
    %c0_61 = arith.constant 0 : index
    %159 = vector.load %arg15[%c0_60, %c0_61] : memref<1x32xf32, #tpu.memory_space<vmem>>, vector<1x32xf32>
    %160 = vector.broadcast %159 : vector<1x32xf32> to vector<9x32xf32>
    %161 = arith.addf %158, %160 : vector<9x32xf32>
    %162 = arith.addf %147, %161 : vector<9x32xf32>
    %cst_62 = arith.constant dense<0.000000e+00> : vector<9xf32>
    %163 = vector.multi_reduction <add>, %162, %cst_62 [1] : vector<9x32xf32> to vector<9xf32>
    %164 = vector.shape_cast %163 : vector<9xf32> to vector<9x1xf32>
    %cst_63 = arith.constant 3.200000e+01 : f32
    %165 = vector.broadcast %cst_63 : f32 to vector<9x1xf32>
    %166 = arith.divf %164, %165 : vector<9x1xf32>
    %167 = vector.broadcast %166 : vector<9x1xf32> to vector<9x32xf32>
    %168 = arith.subf %162, %167 : vector<9x32xf32>
    %169 = arith.mulf %168, %168 : vector<9x32xf32>
    %cst_64 = arith.constant dense<0.000000e+00> : vector<9xf32>
    %170 = vector.multi_reduction <add>, %169, %cst_64 [1] : vector<9x32xf32> to vector<9xf32>
    %171 = vector.shape_cast %170 : vector<9xf32> to vector<9x1xf32>
    %cst_65 = arith.constant 3.200000e+01 : f32
    %172 = vector.broadcast %cst_65 : f32 to vector<9x1xf32>
    %173 = arith.divf %171, %172 : vector<9x1xf32>
    %cst_66 = arith.constant 9.99999974E-6 : f32
    %174 = vector.broadcast %cst_66 : f32 to vector<9x1xf32>
    %175 = arith.addf %173, %174 : vector<9x1xf32>
    %176 = math.rsqrt %175 : vector<9x1xf32>
    %177 = vector.broadcast %176 : vector<9x1xf32> to vector<9x32xf32>
    %178 = arith.mulf %168, %177 : vector<9x32xf32>
    %c0_67 = arith.constant 0 : index
    %c0_68 = arith.constant 0 : index
    %179 = vector.load %arg18[%c0_67, %c0_68] : memref<1x32xf32, #tpu.memory_space<vmem>>, vector<1x32xf32>
    %180 = vector.broadcast %179 : vector<1x32xf32> to vector<9x32xf32>
    %181 = arith.mulf %178, %180 : vector<9x32xf32>
    %c0_69 = arith.constant 0 : index
    %c0_70 = arith.constant 0 : index
    %182 = vector.load %arg19[%c0_69, %c0_70] : memref<1x32xf32, #tpu.memory_space<vmem>>, vector<1x32xf32>
    %183 = vector.broadcast %182 : vector<1x32xf32> to vector<9x32xf32>
    %184 = arith.addf %181, %183 : vector<9x32xf32>
    %185 = vector.extract_strided_slice %184 {offsets = [0, 0], sizes = [8, 32], strides = [1, 1]} : vector<9x32xf32> to vector<8x32xf32>
    %c0_71 = arith.constant 0 : index
    %c0_72 = arith.constant 0 : index
    %c0_73 = arith.constant 0 : index
    %186 = vector.load %arg21[%c0_71, %c0_72, %c0_73] : memref<1x8x32xf32, #tpu.memory_space<vmem>>, vector<1x8x32xf32>
    %187 = vector.shape_cast %186 : vector<1x8x32xf32> to vector<8x32xf32>
    %188 = vector.shape_cast %185 : vector<8x32xf32> to vector<1x8x32xf32>
    tpu.vector_store %arg21[%c0_71, %c0_72, %c0_73], %188 {strides = array<i32>} : memref<1x8x32xf32, #tpu.memory_space<vmem>>, vector<1x8x32xf32>,
    %189 = vector.extract_strided_slice %184 {offsets = [8, 0], sizes = [1, 32], strides = [1, 1]} : vector<9x32xf32> to vector<1x32xf32>
    %c0_74 = arith.constant 0 : index
    %c0_75 = arith.constant 0 : index
    %c0_76 = arith.constant 0 : index
    %190 = vector.load %arg22[%c0_74, %c0_75, %c0_76] : memref<1x1x32xf32, #tpu.memory_space<vmem>>, vector<1x1x32xf32>
    %191 = vector.shape_cast %190 : vector<1x1x32xf32> to vector<1x32xf32>
    %192 = vector.shape_cast %189 : vector<1x32xf32> to vector<1x1x32xf32>
    tpu.vector_store %arg22[%c0_74, %c0_75, %c0_76], %192 {strides = array<i32>} : memref<1x1x32xf32, #tpu.memory_space<vmem>>, vector<1x1x32xf32>,
    return
  }
  func.func @transform_0(%arg0: i32) -> (i32, i32, i32) {
    %c0_i32 = arith.constant 0 : i32
    %c0_i32_0 = arith.constant 0 : i32
    %c0_i32_1 = arith.constant 0 : i32
    return %arg0, %c0_i32, %c0_i32_0 : i32, i32, i32
  }
  func.func @transform_1(%arg0: i32) -> (i32, i32, i32) {
    %c0_i32 = arith.constant 0 : i32
    %c0_i32_0 = arith.constant 0 : i32
    %c0_i32_1 = arith.constant 0 : i32
    return %arg0, %c0_i32, %c0_i32_0 : i32, i32, i32
  }
  func.func @transform_2(%arg0: i32) -> (i32, i32, i32) {
    %c0_i32 = arith.constant 0 : i32
    %c0_i32_0 = arith.constant 0 : i32
    %c0_i32_1 = arith.constant 0 : i32
    return %arg0, %c0_i32, %c0_i32_0 : i32, i32, i32
  }
  func.func @transform_3(%arg0: i32) -> (i32, i32) {
    %c0_i32 = arith.constant 0 : i32
    %c0_i32_0 = arith.constant 0 : i32
    %c0_i32_1 = arith.constant 0 : i32
    return %c0_i32, %c0_i32_0 : i32, i32
  }
  func.func @transform_4(%arg0: i32) -> (i32, i32) {
    %c0_i32 = arith.constant 0 : i32
    %c0_i32_0 = arith.constant 0 : i32
    %c0_i32_1 = arith.constant 0 : i32
    return %c0_i32, %c0_i32_0 : i32, i32
  }
  func.func @transform_5(%arg0: i32) -> (i32, i32) {
    %c0_i32 = arith.constant 0 : i32
    %c0_i32_0 = arith.constant 0 : i32
    %c0_i32_1 = arith.constant 0 : i32
    return %c0_i32, %c0_i32_0 : i32, i32
  }
  func.func @transform_6(%arg0: i32) -> (i32, i32) {
    %c0_i32 = arith.constant 0 : i32
    %c0_i32_0 = arith.constant 0 : i32
    %c0_i32_1 = arith.constant 0 : i32
    return %c0_i32, %c0_i32_0 : i32, i32
  }
  func.func @transform_7(%arg0: i32) -> (i32, i32) {
    %c0_i32 = arith.constant 0 : i32
    %c0_i32_0 = arith.constant 0 : i32
    %c0_i32_1 = arith.constant 0 : i32
    return %c0_i32, %c0_i32_0 : i32, i32
  }
  func.func @transform_8(%arg0: i32) -> (i32, i32) {
    %c0_i32 = arith.constant 0 : i32
    %c0_i32_0 = arith.constant 0 : i32
    %c0_i32_1 = arith.constant 0 : i32
    return %c0_i32, %c0_i32_0 : i32, i32
  }
  func.func @transform_9(%arg0: i32) -> (i32, i32) {
    %c0_i32 = arith.constant 0 : i32
    %c0_i32_0 = arith.constant 0 : i32
    %c0_i32_1 = arith.constant 0 : i32
    return %c0_i32, %c0_i32_0 : i32, i32
  }
  func.func @transform_10(%arg0: i32) -> (i32, i32) {
    %c0_i32 = arith.constant 0 : i32
    %c0_i32_0 = arith.constant 0 : i32
    %c0_i32_1 = arith.constant 0 : i32
    return %c0_i32, %c0_i32_0 : i32, i32
  }
  func.func @transform_11(%arg0: i32) -> (i32, i32) {
    %c0_i32 = arith.constant 0 : i32
    %c0_i32_0 = arith.constant 0 : i32
    %c0_i32_1 = arith.constant 0 : i32
    return %c0_i32, %c0_i32_0 : i32, i32
  }
  func.func @transform_12(%arg0: i32) -> (i32, i32) {
    %c0_i32 = arith.constant 0 : i32
    %c0_i32_0 = arith.constant 0 : i32
    %c0_i32_1 = arith.constant 0 : i32
    return %c0_i32, %c0_i32_0 : i32, i32
  }
  func.func @transform_13(%arg0: i32) -> (i32, i32) {
    %c0_i32 = arith.constant 0 : i32
    %c0_i32_0 = arith.constant 0 : i32
    %c0_i32_1 = arith.constant 0 : i32
    return %c0_i32, %c0_i32_0 : i32, i32
  }
  func.func @transform_14(%arg0: i32) -> (i32, i32) {
    %c0_i32 = arith.constant 0 : i32
    %c0_i32_0 = arith.constant 0 : i32
    %c0_i32_1 = arith.constant 0 : i32
    return %c0_i32, %c0_i32_0 : i32, i32
  }
  func.func @transform_15(%arg0: i32) -> (i32, i32) {
    %c0_i32 = arith.constant 0 : i32
    %c0_i32_0 = arith.constant 0 : i32
    %c0_i32_1 = arith.constant 0 : i32
    return %c0_i32, %c0_i32_0 : i32, i32
  }
  func.func @transform_16(%arg0: i32) -> (i32, i32) {
    %c0_i32 = arith.constant 0 : i32
    %c0_i32_0 = arith.constant 0 : i32
    %c0_i32_1 = arith.constant 0 : i32
    return %c0_i32, %c0_i32_0 : i32, i32
  }
  func.func @transform_17(%arg0: i32) -> (i32, i32) {
    %c0_i32 = arith.constant 0 : i32
    %c0_i32_0 = arith.constant 0 : i32
    %c0_i32_1 = arith.constant 0 : i32
    return %c0_i32, %c0_i32_0 : i32, i32
  }
  func.func @transform_18(%arg0: i32) -> (i32, i32) {
    %c0_i32 = arith.constant 0 : i32
    %c0_i32_0 = arith.constant 0 : i32
    %c0_i32_1 = arith.constant 0 : i32
    return %c0_i32, %c0_i32_0 : i32, i32
  }
  func.func @transform_19(%arg0: i32) -> (i32, i32) {
    %c0_i32 = arith.constant 0 : i32
    %c0_i32_0 = arith.constant 0 : i32
    %c0_i32_1 = arith.constant 0 : i32
    return %c0_i32, %c0_i32_0 : i32, i32
  }
  func.func @transform_20(%arg0: i32) -> (i32, i32, i32) {
    %c0_i32 = arith.constant 0 : i32
    %c0_i32_0 = arith.constant 0 : i32
    %c0_i32_1 = arith.constant 0 : i32
    return %arg0, %c0_i32, %c0_i32_0 : i32, i32, i32
  }
  func.func @transform_21(%arg0: i32) -> (i32, i32, i32) {
    %c0_i32 = arith.constant 0 : i32
    %c0_i32_0 = arith.constant 0 : i32
    %c0_i32_1 = arith.constant 0 : i32
    return %arg0, %c0_i32, %c0_i32_0 : i32, i32, i32
  }
}

</mosaic_0001>

<bundles_post_ra>
// kernel: star_transformer_layer.1
= control target key start
LH: loop header
LB: loop body
LE: loop exit
PB: predicated region body
PF: predicated region fallthrough
CT: control target
= control target key end

     0   :  { %s2021_s0 = inlined_call_operand.vmem [shape: f32[2,8,32], index: 0, kind: input, shape index: {}]   ;;  %s2022_s1 = inlined_call_operand.vmem [shape: f32[2,8,32], index: 1, kind: input, shape index: {}]   ;;  %s2023_s2 = inlined_call_operand.vmem [shape: f32[2,1,32], index: 2, kind: input, shape index: {}]   ;;  %s2024_s3 = inlined_call_operand.vmem [shape: bf16[32,32], index: 3, kind: input, shape index: {}]   ;;  %s2025_s4 = inlined_call_operand.vmem [shape: f32[1,32], index: 4, kind: input, shape index: {}]   ;;  %s2026_s5 = inlined_call_operand.vmem [shape: bf16[32,32], index: 5, kind: input, shape index: {}]   ;;  %s2027_s6 = inlined_call_operand.vmem [shape: f32[1,32], index: 6, kind: input, shape index: {}]   ;;  %s2028_s7 = inlined_call_operand.vmem [shape: bf16[32,32], index: 7, kind: input, shape index: {}]   ;;  %s2029_s8 = inlined_call_operand.vmem [shape: f32[1,32], index: 8, kind: input, shape index: {}]   ;;  %s2030_s9 = inlined_call_operand.vmem [shape: bf16[32,32], index: 9, kind: input, shape index: {}]   ;;  %s2031_s10 = inlined_call_operand.vmem [shape: f32[1,32], index: 10, kind: input, shape index: {}]   ;;  %s2032_s11 = inlined_call_operand.vmem [shape: bf16[32,64], index: 11, kind: input, shape index: {}]   ;;  %s2033_s12 = inlined_call_operand.vmem [shape: f32[1,64], index: 12, kind: input, shape index: {}]   ;;  %s2034_s13 = inlined_call_operand.vmem [shape: bf16[64,32], index: 13, kind: input, shape index: {}]   ;;  %s2035_s14 = inlined_call_operand.vmem [shape: f32[1,32], index: 14, kind: input, shape index: {}]   ;;  %s2036_s15 = inlined_call_operand.vmem [shape: f32[1,32], index: 15, kind: input, shape index: {}]   ;;  %s2037_s16 = inlined_call_operand.vmem [shape: f32[1,32], index: 16, kind: input, shape index: {}]   ;;  %s2038_s17 = inlined_call_operand.vmem [shape: f32[1,32], index: 17, kind: input, shape index: {}]   ;;  %s2039_s18 = inlined_call_operand.vmem [shape: f32[1,32], index: 18, kind: input, shape index: {}]   ;;  %s2040_s19 = inlined_call_operand.vmem [shape: bf16[32,32], index: 19, kind: input, shape index: {}]   ;;  %s2041_s20 = inlined_call_operand.vmem [shape: f32[2,8,32], index: 20, kind: output, shape index: {0}]   ;;  %s2042_s21 = inlined_call_operand.hbm [shape: f32[2,1,32], index: 21, kind: output, shape index: {1}]  }
   0x1   :  { %2056 = sst [smem:[#allocation12_spill]] %s2021_s0 }
   0x2   :  { %2057 = sst [smem:[#allocation13_spill]] %s2022_s1 }
   0x3   :  { %2058 = sst [smem:[#allocation14_spill]] %s2023_s2 }
   0x4   :  { %2059 = sst [smem:[#allocation15_spill]] %s2024_s3 }
   0x5   :  { %2060 = sst [smem:[#allocation16_spill]] %s2025_s4 }
   0x6   :  { %2061 = sst [smem:[#allocation17_spill]] %s2026_s5 }
   0x7   :  { %2062 = sst [smem:[#allocation18_spill]] %s2027_s6 }
   0x8   :  { %2063 = sst [smem:[#allocation19_spill]] %s2042_s21 }
   0x9   :  { %27 = vsyncpa [#allocation3], 0 }
   0xa   :  { %29 = vsyncpa [#allocation3 + $0x1], 0  ;;  %s1781_s2 = smov 0   ;;  %s1783_s25 = smov 0  }
   0xb   :  { %s1785_s26 = smov 0   ;;  %s1787_s27 = smov 0  }
   0xc LB: > { %2064 = sst [smem:[#allocation5_spill]] %s1656_s2  ;;  %s1802_s3 = sadd.s32 4294967295, %s1668_s27   ;;  %s1668_s27 = sphi %s1787_s27, %s2086_s27   ;;  %s1664_s26 = sphi %s1785_s26, %s2088_s26   ;;  %s1660_s25 = sphi %s1783_s25, %s2090_s25   ;;  %s1656_s2 = sphi %s1781_s2, %s2089_s2  }
   0xd   : > { %2065 = sst [smem:[#allocation6_spill]] %s1664_s26  ;;  %s1424_s28 = sadd.s32 4294967294, %s1668_s27  }
   0xe   : > { %2066 = sst [smem:[#allocation7_spill]] %s1668_s27  ;;  %s1806_s29 = sadd.s32 1, %s1668_s27  }
   0xf   : > { %2067 = sst [smem:[#allocation8_spill]] %s1806_s29  ;;  %s503_s0 = sadd.s32 1, %s1664_s26 }
  0x10   : > { %s500_s4 = ssub.s32 %s1668_s27, %s1806_s29  ;;  %p513_p0 = scmp.ne.s32.totalorder %s1664_s26, %s1660_s25 }
  0x11   : > { %p501_p1 = scmp.eq.s32.totalorder %s500_s4, 0  ;;  %p514_p2 = scmp.eq.s32.totalorder %s1802_s3, 1 }
  0x12   : > { %p519_p3 = scmp.ne.s32.totalorder %s1660_s25, %s1656_s2  ;;  %p520_p4 = scmp.eq.s32.totalorder %s1424_s28, 1 }
  0x13   : > { %s1817_s30 = scalar_select %p501_p1, %s1664_s26, %s503_s0  }
  0x14   : > { %p1819_p5 = por %p514_p2, %p513_p0  ;;  %p1823_p6 = por %p520_p4, %p519_p3 }
  0x15   : > { %2068 = sst [smem:[#allocation9_spill]] %s1817_s30  ;;  %p1427_p7 = scmp.ge.s32.totalorder %s1668_s27, 1 }
  0x16   : > { %s2069_s5 = scalar_select %p1819_p5, 1, 0 }
  0x17   : > { %s2071_s22 = scalar_select %p1823_p6, 1, 0 }
  0x18   : > { %2070 = sst [smem:[#allocation10_spill]] %s2069_s5  ;;  %p609_p8 = scmp.lt.s32.totalorder %s1668_s27, 3 }
  0x19   : > { %2072 = sst [smem:[#allocation11_spill]] %s2071_s22 }
  0x1a   : > { %p610_p9 = pnand %p1427_p7, %p609_p8 }
  0x1b   : > { %s2073_s24 = sld [smem:[#allocation17_spill]] (!%p610_p9)  ;;  %p678_p10 = scmp.lt.s32.totalorder (!%p610_p9), %s1802_s3, 1 }
  0x1c   : > { %613 = sbr.rel (%p610_p9) target bundleno = 1563 (0x61b), region = 100  ;;  %s2074_s4 = sld [smem:[#allocation15_spill]] (!%p610_p9) }
  0x1d   : > { %s2075_s27 = sld [smem:[#allocation12_spill]] (!%p610_p9)  ;;  %s676_s0 = sand.u32 (!%p610_p9), 1, %s1660_s25  }
  0x1e   : > { %s2078_s6 = sld [smem:[#allocation18_spill]] (!%p610_p9) }
  0x21   : > { %v1515_v0 = vld [vmem:[%s2073_s24 + $0x8] sm:$0xff]  ;;  %v1514_v2 = vld [vmem:[%s2073_s24] sm:$0xff]  ;;  %s679_s23 = scalar_select %p678_p10, %s1802_s3, 1  ;;  %vm723_vm0 = vcmask 261120   ;;  %vm827_vm1 = vcmask 1040384   ;;  %vm831_vm2 = vcmask 1046528  }
  0x22   : > { %v1519_v1 = vld [vmem:[%s2074_s4 + $0x8] sm:$0xff]  ;;  %v1518_v3 = vld [vmem:[%s2074_s4] sm:$0xff]  ;;  %736 = vmatpush.bf16.msra.mxu0 %v1515_v0  ;;  %s2076_s24 = sld [smem:[#allocation13_spill]]  ;;  %vm1001_vm3 = vcmask 253952   ;;  %vm1005_vm4 = vcmask 57344   ;;  %vm1028_vm5 = vcmask 1043456  }
  0x23   : > { %v1517_v4 = vld [vmem:[%s2028_s7 + $0x8] sm:$0xff]  ;;  %816 = vmatpush.bf16.msra.mxu2 %v1519_v1  ;;  %v1516_v5 = vld [vmem:[%s2028_s7] sm:$0xff]  ;;  %s1852_s26 = sshll.u32 %s679_s23, 3  ;;  %s2077_s4 = sld [smem:[#allocation14_spill]]  ;;  %vm1024_vm6 = vcmask 64512   ;;  %vm1226_vm14 = vcmask 523264  }
  0x24   : > { %v1513_v6 = vld [vmem:[%s2040_s19 + $0x8] sm:$0xff]  ;;  %774 = vmatpush.bf16.msra.mxu1 %v1517_v4  ;;  %s681_s30 = scalar_lea.vmem %s2075_s27, %s1852_s26  ;;  %v1512_v13 = vld [vmem:[%s2040_s19] sm:$0xff]  ;;  %s2079_s27 = sld [smem:[#allocation16_spill]] }
  0x25   : > { %863 = vmatpush.bf16.msra.mxu3 %v1513_v6  ;;  %v1862_v7 = vld [vmem:[%s681_s30] sm:$0xff] }
  0x26   : > { %737 = vmatpush.bf16.msra.mxu0 %v1514_v2  ;;  %v786_v10 = vpack.c.bf16 %v1862_v7, %v1862_v7  ;;  %v1568_v14 = vld [vmem:[%s2078_s6] ss:$0 sm:$0xff] }
  0x27   : > { %817 = vmatpush.bf16.msra.mxu2 %v1518_v3  ;;  %v1570_v26 = vld [vmem:[%s2029_s8] ss:$0 sm:$0xff] }
  0x28   : > { %s685_s21 = scalar_lea.vmem %s2076_s24, %s1852_s26  ;;  %775 = vmatpush.bf16.msra.mxu1 %v1516_v5  ;;  %s677_s24 = scalar_lea.vmem [#allocation2], %s676_s0 }
  0x29   : > { %v695_v8 = vld [vmem:[%s685_s21] sm:$0xff]  ;;  %s688_s21 = scalar_lea.vmem %s2077_s4, %s679_s23  ;;  %864 = vmatpush.bf16.msra.mxu3 %v1512_v13  ;;  %s692_s23 = scalar_lea.vmem %s2041_s20, %s1852_s26 }
  0x2a   : > { %v701_v9 = vpack.c.bf16 %v695_v8, %v1862_v7  ;;  %917 = vmatpush.bf16.msrb.mxu0 %v1513_v6  ;;  %1459 = vmatmul.msk.bf16.vlgmr.msra.gmra.mxu2 %vm723_vm0, %v786_v10  ;;  %v1873_v11 = vld [vmem:[%s688_s21] sm:$0x1]  ;;  %s1322_s4 = sshll.u32 %s677_s24, 4  ;;  %s1309_s26 = scalar_lea.sflag [#allocation3], %s676_s0  ;;  %s1323_s4 = int_to_ptr.vmem [resolvable:$true] %s1322_s4 }
  0x2b   : > { %881 = vmatpush.bf16.msrb.mxu2 %v1513_v6  ;;  %v702_v12 = vpack.c.bf16 %v1873_v11, %v1873_v11  ;;  %v1569_v18 = vld [vmem:[%s2079_s27] ss:$0 sm:$0xff]  ;;  %v978_v46 = vmul.f32 0.35355338, %v1873_v11  ;;  %s2080_s27 = sld [smem:[#allocation19_spill]] }
  0x2c   : > { %936 = vmatpush.bf16.msrb.mxu1 %v1513_v6  ;;  %1439 = vmatmul.msk.bf16.vlgmr.msra.gmra.mxu0 %vm723_vm0, %v701_v9 }
  0x2d   : > { %1449 = vmatmul.msk.bf16.vlgmr.msra.gmra.mxu1 %vm723_vm0, %v701_v9  ;;  %899 = vmatpush.bf16.msrb.mxu3 %v1513_v6  ;;  %v979_v51 = vpack.c.bf16 %v978_v46, %v978_v46 }
  0x2e   : > { %918 = vmatpush.bf16.msrb.mxu0 %v1512_v13 }
  0x2f   : > { %882 = vmatpush.bf16.msrb.mxu2 %v1512_v13 }
  0x30   : > { %937 = vmatpush.bf16.msrb.mxu1 %v1512_v13 }
  0x31   : > { %900 = vmatpush.bf16.msrb.mxu3 %v1512_v13  ;;  %s2081_s30 = smov %s2080_s27  ;;  %s1320_s22 = scalar_lea.hbm %s2080_s27, %s1802_s3 }
  0x32   : > { %s1324_s21 = sshll.u32 %s1320_s22, 4  ;;  %s1626_s29 = scalar_lea.hbm %s2081_s30, 2  ;;  %s1325_s21 = int_to_ptr.hbm [resolvable:$true] %s1324_s21 }
  0x33   : > { %s1620_s1 = sshra.s32 %s1325_s21, 4  ;;  %s1621_s1 = int_to_ptr.hbm [resolvable:$true] %s1620_s1 }
  0x34   : > { %s1622_s28 = scalar_lea.hbm %s1621_s1, 1  ;;  %p1627_p0 = scmp.lt.s32.totalorder %s1621_s1, %s2081_s30 }
  0x35   : > { %p1623_p11 = scmp.ne.s32.totalorder %s1621_s1, %s1622_s28  ;;  %p1628_p1 = scmp.lt.s32.totalorder %s1626_s29, %s1622_s28 }
  0x37   : > { %p1624_p12 = pnand %p1623_p11, %p1819_p5  ;;  %p1629_p2 = por %p1628_p1, %p1627_p0 }
  0x39   : > { %p1625_p13 = pneg %p1624_p12 }
  0x3b   : > { %p1630_p3 = pnand %p1629_p2, %p1625_p13 }
  0x3c   : > { %1440 = vmatmul.msk.bf16.gmra.mxu0 %vm723_vm0, %v702_v12 }
  0x3d   : > { %1450 = vmatmul.msk.bf16.gmra.mxu1 %vm723_vm0, %v702_v12 }
  0xa9   : > { %v739_v15 = vpop.f32.mrf.mxu0 }
  0xaa   : > { %v740_v16 = vadd.f32 %v1568_v14, %v739_v15  ;;  %v1885_v17 = vpop.f32.mrf.mxu1 }
  0xab   : > { %v778_v6 = vadd.f32 %v1570_v26, %v1885_v17 }
  0xac   : > { %v980_v19 = vpack.c.bf16 %v740_v16, %v740_v16  ;;  %v825_v20 = vrot.slane %v740_v16, 7  ;;  %v829_v41 = vrot.slane %v740_v16, 1 }
  0xad   : > { %v819_v22 = vpop.f32.mrf.mxu2 }
  0xae   : > { %v985_v21 = vsel %vm723_vm0, %v980_v19, 0  ;;  %v820_v23 = vadd.f32 %v1569_v18, %v819_v22  ;;  %v828_v25 = vsel %vm827_vm1, 0.0, %v825_v20  ;;  %v832_v45 = vsel %vm831_vm2, %v829_v41, 0.0 }
  0xaf   : > { %994 = vmatpush.bf16.xpose.msra.mxu2 %v985_v21  ;;  %v834_v21 = vrot.slane %v778_v6, 7 }
  0xb0   : > { %v823_v27 = vmul.f32 0.35355338, %v820_v23  ;;  %v837_v23 = vrot.slane %v778_v6, 1 }
  0xb1   : > { %v741_v24 = vpop.f32.mrf.mxu0  ;;  %v836_v17 = vsel %vm827_vm1, 0.0, %v834_v21 }
  0xb2   : > { %v742_v28 = vadd.f32 %v1568_v14, %v741_v24  ;;  %v779_v29 = vpop.f32.mrf.mxu1  ;;  %v840_v32 = vmul.f32 %v828_v25, %v823_v27  ;;  %v870_v33 = vmul.f32 %v823_v27, %v740_v16  ;;  %v888_v49 = vmul.f32 %v832_v45, %v823_v27 }
  0xb3   : > { %v1895_v30 = vadd.f32 %v1570_v26, %v779_v29  ;;  %v839_v25 = vsel %vm831_vm2, %v837_v23, 0.0 }
  0xb4   : > { %v906_v31 = vmul.f32 %v823_v27, %v742_v28  ;;  %v841_v35 = vpack.c.bf16 %v840_v32, %v840_v32  ;;  %v871_v36 = vpack.c.bf16 %v870_v33, %v870_v33  ;;  %v889_v52 = vpack.c.bf16 %v888_v49, %v888_v49 }
  0xb5   : > { %v821_v37 = vpop.f32.mrf.mxu2 }
  0xb6   : > { %v907_v34 = vpack.c.bf16 %v906_v31, %v906_v31  ;;  %1468 = vmatmul.msk.bf16.vlgmr.msra.gmra.mxu3 %vm723_vm0, %v841_v35  ;;  %1469 = vmatmul.msk.bf16.vlgmr.msrb.gmra.mxu2 %vm723_vm0, %v871_v36 }
  0xb8   : > { %1471 = vmatmul.msk.bf16.vlgmr.msrb.gmra.mxu0 %vm723_vm0, %v907_v34 }
  0xb9   : > { %v744_v38 = vpop.f32.mrf.mxu0 }
  0xba   : > { %v745_v39 = vadd.f32 %v1568_v14, %v744_v38  ;;  %v782_v40 = vpop.f32.mrf.mxu1 }
  0xbb   : > { %v1900_v42 = vadd.f32 %v1570_v26, %v782_v40 }
  0xbc   : > { %v924_v43 = vperm.slane %v745_v39, 0  ;;  %v1000_v53 = vmul.f32 %v978_v46, %v745_v39 }
  0xbe   : > { %v925_v44 = vmul.f32 %v924_v43, %v823_v27  ;;  %v1002_v54 = vsel %vm1001_vm3, %v1000_v53, 0.0  ;;  %v974_v27 = vperm.slane %v1900_v42, 0 }
  0xbf   : > { %1003 = vadd.xlane.f32.xlu0 %v1002_v54 }
  0xc0   : > { %v926_v47 = vpack.c.bf16 %v925_v44, %v925_v44 }
  0xc1   : > { %v746_v48 = vpop.f32.mrf.mxu0 }
  0xc2   : > { %1472 = vmatmul.msk.bf16.vlgmr.msrb.gmra.mxu1 %vm723_vm0, %v926_v47  ;;  %v784_v50 = vpop.f32.mrf.mxu1  ;;  %v1022_v48 = vpack.c.bf16 %v778_v6, %v778_v6 }
  0xc4   : > { %v1030_v49 = vsel %vm1028_vm5, %v1022_v48, 0 }
  0xc5   : > { %1039 = vmatpush.bf16.msra.mxu3 %v1030_v49 }
  0xc6   : > { %1470 = vmatmul.msk.bf16.vlgmr.msrb.gmra.mxu3 %vm723_vm0, %v889_v52  ;;  %1473 = vmatmul.msk.bf16.vlgmr.msra.gmra.mxu2 %vm723_vm0, %v979_v51 }
 0x132   : > { %v1004_v50 = vpop.xlane.xlu0 %1003 }
 0x135   : > { %v920_v55 = vpop.f32.mrf.mxu0 }
 0x139   : > { %v866_v56 = vpop.f32.mrf.mxu3  ;;  %v884_v57 = vpop.f32.mrf.mxu2 }
 0x13a   : > { %v943_v58 = vmax.f32 %v866_v56, %v884_v57 }
 0x13d   : > { %v922_v59 = vpop.f32.mrf.mxu0 }
 0x13f   : > { %v939_v60 = vpop.f32.mrf.mxu1 }
 0x141   : > { %v868_v61 = vpop.f32.mrf.mxu3  ;;  %v886_v62 = vpop.f32.mrf.mxu2 }
 0x142   : > { %v1521_v61 = vld [vmem:[%s2030_s9 + $0x8] sm:$0xff]  ;;  %v1520_v62 = vld [vmem:[%s2030_s9] sm:$0xff] }
 0x143   : > { %1076 = vmatpush.bf16.msra.mxu0 %v1521_v61 }
 0x147   : > { %v941_v63 = vpop.f32.mrf.mxu1  ;;  %1077 = vmatpush.bf16.msra.mxu0 %v1520_v62 }
 0x149   : > { %v902_v0 = vpop.f32.mrf.mxu3  ;;  %v996_v1 = vpop.f32.mrf.mxu2 }
 0x14a   : > { %v944_v2 = vmax.f32 %v902_v0, %v920_v55  ;;  %v1006_v3 = vsel %vm1005_vm4, %v996_v1, -inf }
 0x14b   : > { %1007 = vmax.xlane.f32.xlu0 %v1006_v3 }
 0x14c   : > { %v945_v4 = vmax.f32 %v943_v58, %v944_v2 }
 0x14e   : > { %v946_v5 = vmax.f32 %v945_v4, %v939_v60 }
 0x150   : > { %v947_v8 = vsub.f32 %v866_v56, %v946_v5  ;;  %v950_v9 = vsub.f32 %v884_v57, %v946_v5  ;;  %v953_v10 = vsub.f32 %v902_v0, %v946_v5  ;;  %v956_v12 = vsub.f32 %v920_v55, %v946_v5 }
 0x151   : > { %v959_v13 = vsub.f32 %v939_v60, %v946_v5  ;;  %v904_v14 = vpop.f32.mrf.mxu3  ;;  %v998_v15 = vpop.f32.mrf.mxu2 }
 0x152   : > { %v948_v16 = vmul.f32 1.442695, %v947_v8  ;;  %v951_v18 = vmul.f32 1.442695, %v950_v9  ;;  %v954_v19 = vmul.f32 1.442695, %v953_v10 }
 0x153   : > { %v957_v20 = vmul.f32 1.442695, %v956_v12  ;;  %v960_v22 = vmul.f32 1.442695, %v959_v13 }
 0x154   : > { %1578 = vpow2.f32 %v948_v16 }
 0x155   : > { %1580 = vpow2.f32 %v951_v18  ;;  %v1670_v18 = vmov 32.0  }
 0x156   : > { %1582 = vpow2.f32 %v954_v19 }
 0x157   : > { %1584 = vpow2.f32 %v957_v20 }
 0x158   : > { %1586 = vpow2.f32 %v960_v22 }
 0x15a   : > { %v1579_v24 = vpop.eup %1578 }
 0x15b   : > { %v1581_v26 = vpop.eup %1580  ;;  %v967_v28 = vmul.f32 %v1579_v24, %v836_v17 }
 0x15c   : > { %v1583_v29 = vpop.eup %1582  ;;  %v962_v31 = vadd.f32 %v1581_v26, %v1579_v24  ;;  %v968_v32 = vmul.f32 %v1581_v26, %v778_v6  ;;  %v1571_v6 = vld [vmem:[%s2031_s10] ss:$0 sm:$0xff] }
 0x15d   : > { %v1585_v33 = vpop.eup %1584  ;;  %v970_v34 = vmul.f32 %v1583_v29, %v839_v25 }
 0x15e   : > { %v1587_v35 = vpop.eup %1586  ;;  %v963_v36 = vadd.f32 %v1583_v29, %v962_v31  ;;  %v969_v37 = vadd.f32 %v968_v32, %v967_v28  ;;  %v972_v38 = vmul.f32 %v1585_v33, %v1895_v30 }
 0x15f   : > { %v975_v39 = vmul.f32 %v1587_v35, %v974_v27 }
 0x160   : > { %v964_v40 = vadd.f32 %v1585_v33, %v963_v36  ;;  %v971_v41 = vadd.f32 %v970_v34, %v969_v37  ;;  %v1522_v37 = vld [vmem:[%s2032_s11] sm:$0xff] }
 0x162   : > { %v965_v43 = vadd.f32 %v1587_v35, %v964_v40  ;;  %v973_v44 = vadd.f32 %v972_v38, %v971_v41  ;;  %v1523_v35 = vld [vmem:[%s2032_s11 + $0x8] sm:$0xff]  ;;  %v1527_v38 = vld [vmem:[%s2034_s13 + $0x18] sm:$0xff] }
 0x163   : > { %1179 = vmatpush.bf16.msra.mxu1 %v1523_v35  ;;  %1234 = vmatpush.bf16.msrb.mxu2 %v1527_v38 }
 0x164   : > { %1588 = vrcp.f32 %v965_v43  ;;  %v976_v45 = vadd.f32 %v975_v39, %v973_v44 }
 0x167   : > { %1180 = vmatpush.bf16.msra.mxu1 %v1522_v37 }
 0x16a   : > { %v1589_v46 = vpop.eup %1588 }
 0x16b   : > { %v977_v47 = vmul.f32 %v1589_v46, %v976_v45 }
 0x1be   : > { %v1008_v51 = vpop.xlane.xlu0 %1007 }
 0x1bf   : > { %v1009_v52 = vmax.f32 %v1008_v51, %v1004_v50 }
 0x1c1   : > { %v1010_v53 = vsub.f32 %v996_v1, %v1009_v52  ;;  %v1013_v54 = vsub.f32 %v1004_v50, %v1009_v52 }
 0x1c3   : > { %v1011_v55 = vmul.f32 1.442695, %v1010_v53  ;;  %v1014_v30 = vmul.f32 1.442695, %v1013_v54 }
 0x1c5   : > { %1590 = vpow2.f32 %v1011_v55  ;;  %v1572_v55 = vld [vmem:[%s2036_s15] ss:$0 sm:$0xff] }
 0x1c6   : > { %1592 = vpow2.f32 %v1014_v30 }
 0x1cb   : > { %v1591_v56 = vpop.eup %1590 }
 0x1cc   : > { %v1593_v57 = vpop.eup %1592  ;;  %v1021_v58 = vpack.c.bf16 %v1591_v56, %v1591_v56  ;;  %v1016_v59 = vsel %vm1005_vm4, %v1591_v56, 0.0 }
 0x1cd   : > { %1017 = vadd.xlane.f32.xlu1 %v1016_v59  ;;  %v1023_v60 = vmul.f32 %v1593_v57, %v1900_v42 }
 0x1ce   : > { %1474 = vmatmul.msk.bf16.vlgmr.msra.gmra.mxu3 %vm1024_vm6, %v1021_v58  ;;  %v1573_v58 = vld [vmem:[%s2037_s16] ss:$0 sm:$0xff] }
 0x240   : > { %v1018_v63 = vpop.xlane.xlu1 %1017 }
 0x241   : > { %v1019_v0 = vadd.f32 %v1593_v57, %v1018_v63 }
 0x243   : > { %1594 = vrcp.f32 %v1019_v0 }
 0x244   : > { %1596 = vrcp.f32 %v1670_v18 }
 0x249   : > { %v1595_v3 = vpop.eup %1594 }
 0x24a   : > { %v1597_v19 = vpop.eup %1596 }
 0x24b   : > { %v1093_v20 = vmul.f32 32.0, %v1597_v19  ;;  %vm1097_vm7 = vweird.f32 %v1597_v19 }
 0x24d   : > { %v1094_v21 = vsub.f32 1.0, %v1093_v20 }
 0x24f   : > { %v1095_v22 = vmul.f32 %v1597_v19, %v1094_v21 }
 0x251   : > { %v1041_v1 = vpop.f32.mrf.mxu3  ;;  %v1096_v23 = vadd.f32 %v1597_v19, %v1095_v22 }
 0x252   : > { %v1042_v2 = vadd.f32 %v1041_v1, %v1023_v60  ;;  %v1526_v1 = vld [vmem:[%s2034_s13 + $0x10] sm:$0xff] }
 0x253   : > { %v1930_v17 = vsel %vm1097_vm7, %v1597_v19, %v1096_v23  ;;  %1235 = vmatpush.bf16.msrb.mxu2 %v1526_v1 }
 0x254   : > { %v1045_v4 = vmul.f32 %v1595_v3, %v1042_v2  ;;  %v1525_v2 = vld [vmem:[%s2034_s13 + $0x8] sm:$0xff]  ;;  %v1524_v3 = vld [vmem:[%s2034_s13] sm:$0xff] }
 0x256   : > { %v1046_v5 = vpack.c.bf16 %v1045_v4, %v977_v47 }
 0x257   : > { %1236 = vmatpush.bf16.msrb.mxu2 %v1525_v2 }
 0x258   : > { %1483 = vmatmul.msk.bf16.vlgmr.msra.gmra.mxu0 %vm723_vm0, %v1046_v5  ;;  %v1574_v5 = vld [vmem:[%s2033_s12] ss:$0 sm:$0xff] }
 0x259   : > { %v1043_v42 = vpop.f32.mrf.mxu3 }
 0x25b   : > { %1237 = vmatpush.bf16.msrb.mxu2 %v1524_v3 }
 0x2d5   : > { %v1079_v8 = vpop.f32.mrf.mxu0 }
 0x2d6   : > { %v1080_v9 = vadd.f32 %v1571_v6, %v1079_v8 }
 0x2d8   : > { %v1084_v10 = vadd.f32 %v1080_v9, %v1862_v7 }
 0x2da   : > { %v1086_v12 = vsel %vm723_vm0, %v1084_v10, 0.0 }
 0x2db   : > { %1087 = vadd.xlane.f32.xlu1 %v1086_v12 }
 0x2dd   : > { %v1081_v13 = vpop.f32.mrf.mxu0 }
 0x2de   : > { %v1082_v14 = vadd.f32 %v1571_v6, %v1081_v13  ;;  %v1575_v13 = vld [vmem:[%s2035_s14] ss:$0 sm:$0xff] }
 0x2e0   : > { %v1085_v15 = vadd.f32 %v1082_v14, %v1873_v11 }
 0x2e2   : > { %v1089_v16 = vsel %vm1001_vm3, %v1085_v15, 0.0 }
 0x2e3   : > { %1090 = vadd.xlane.f32.xlu2 %v1089_v16 }
 0x34e   : > { %v1088_v7 = vpop.xlane.xlu1 %1087 }
 0x34f   : > { %v1099_v24 = vmul.f32 %v1930_v17, %v1088_v7 }
 0x351   : > { %v1101_v25 = vsub.f32 %v1084_v10, %v1099_v24 }
 0x353   : > { %v1103_v26 = vmul.f32 %v1101_v25, %v1101_v25 }
 0x355   : > { %v1105_v11 = vsel %vm723_vm0, %v1103_v26, 0.0 }
 0x356   : > { %v1091_v27 = vpop.xlane.xlu2 %1090  ;;  %1106 = vadd.xlane.f32.xlu2 %v1105_v11 }
 0x357   : > { %v1100_v28 = vmul.f32 %v1930_v17, %v1091_v27 }
 0x359   : > { %v1102_v29 = vsub.f32 %v1085_v15, %v1100_v28 }
 0x35b   : > { %v1104_v31 = vmul.f32 %v1102_v29, %v1102_v29 }
 0x35d   : > { %v1108_v32 = vsel %vm1001_vm3, %v1104_v31, 0.0 }
 0x35e   : > { %1109 = vadd.xlane.f32.xlu0 %v1108_v32 }
 0x3c9   : > { %v1107_v33 = vpop.xlane.xlu2 %1106 }
 0x3ca   : > { %v1111_v34 = vmul.f32 %v1107_v33, %v1930_v17 }
 0x3cc   : > { %v1113_v36 = vadd.f32 1e-05, %v1111_v34 }
 0x3ce   : > { %1598 = vrsqrt.f32 %v1113_v36  ;;  %vm1121_vm9 = vweird.f32 %v1113_v36 }
 0x3d1   : > { %v1110_v39 = vpop.xlane.xlu0 %1109 }
 0x3d2   : > { %v1112_v40 = vmul.f32 %v1110_v39, %v1930_v17 }
 0x3d4   : > { %v1599_v41 = vpop.eup %1598  ;;  %v1114_v43 = vadd.f32 1e-05, %v1112_v40 }
 0x3d5   : > { %v1116_v44 = vmul.f32 %v1599_v41, %v1113_v36  ;;  %vm1122_vm8 = vweird.f32 %v1599_v41 }
 0x3d6   : > { %1600 = vrsqrt.f32 %v1114_v43  ;;  %vm1123_vm10 = vmor %vm1121_vm9, %vm1122_vm8  ;;  %vm1131_vm12 = vweird.f32 %v1114_v43 }
 0x3d7   : > { %v1117_v45 = vmul.f32 %v1599_v41, %v1116_v44 }
 0x3d9   : > { %v1118_v46 = vmul.f32 0.5, %v1117_v45 }
 0x3db   : > { %v1119_v47 = vsub.f32 1.5, %v1118_v46 }
 0x3dc   : > { %v1601_v48 = vpop.eup %1600 }
 0x3dd   : > { %v1120_v49 = vmul.f32 %v1599_v41, %v1119_v47  ;;  %v1126_v50 = vmul.f32 %v1601_v48, %v1114_v43  ;;  %vm1132_vm11 = vweird.f32 %v1601_v48  ;;  %v1576_v47 = vld [vmem:[%s2038_s17] ss:$0 sm:$0xff] }
 0x3de   : > { %vm1133_vm13 = vmor %vm1131_vm12, %vm1132_vm11 }
 0x3df   : > { %v1127_v51 = vmul.f32 %v1601_v48, %v1126_v50  ;;  %v1124_v52 = vsel %vm1123_vm10, %v1599_v41, %v1120_v49  ;;  %v1577_v50 = vld [vmem:[%s2039_s18] ss:$0 sm:$0xff] }
 0x3e0   : > { %v1135_v30 = vmul.f32 %v1124_v52, %v1101_v25 }
 0x3e1   : > { %v1128_v53 = vmul.f32 0.5, %v1127_v51 }
 0x3e2   : > { %v1141_v59 = vmul.f32 %v1572_v55, %v1135_v30 }
 0x3e3   : > { %v1129_v54 = vsub.f32 1.5, %v1128_v53 }
 0x3e4   : > { %v1147_v62 = vadd.f32 %v1573_v58, %v1141_v59 }
 0x3e5   : > { %v1130_v56 = vmul.f32 %v1601_v48, %v1129_v54 }
 0x3e7   : > { %v1134_v57 = vsel %vm1133_vm13, %v1601_v48, %v1130_v56 }
 0x3e8   : > { %v1136_v60 = vmul.f32 %v1134_v57, %v1102_v29 }
 0x3ea   : > { %v1142_v61 = vmul.f32 %v1572_v55, %v1136_v60 }
 0x3ec   : > { %v1148_v63 = vadd.f32 %v1573_v58, %v1142_v61 }
 0x3ee   : > { %v1149_v0 = vpack.c.bf16 %v1148_v63, %v1147_v62 }
 0x3f0   : > { %1492 = vmatmul.msk.bf16.vlgmr.msra.gmra.mxu1 %vm723_vm0, %v1149_v0 }
 0x46d   : > { %v1182_v4 = vpop.f32.mrf.mxu1 }
 0x46e   : > { %v1183_v42 = vadd.f32 %v1574_v5, %v1182_v4 }
 0x470   : > { %v1187_v9 = vmax.f32 %v1183_v42, 0.0 }
 0x475   : > { %v1184_v6 = vpop.f32.mrf.mxu1 }
 0x476   : > { %v1185_v8 = vadd.f32 %v1574_v5, %v1184_v6 }
 0x478   : > { %v1188_v10 = vmax.f32 %v1185_v8, 0.0 }
 0x47a   : > { %v1189_v12 = vpack.c.bf16 %v1188_v10, %v1187_v9 }
 0x47c   : > { %1509 = vmatmul.msk.bf16.vlgmr.msrb.gmra.mxu2 %vm1226_vm14, %v1189_v12 }
 0x4ff   : > { %v1239_v14 = vpop.f32.mrf.mxu2 }
 0x500   : > { %v1240_v15 = vadd.f32 %v1575_v13, %v1239_v14 }
 0x502   : > { %v1244_v16 = vadd.f32 %v1240_v15, %v1147_v62 }
 0x504   : > { %v1246_v18 = vsel %vm723_vm0, %v1244_v16, 0.0 }
 0x505   : > { %1247 = vadd.xlane.f32.xlu2 %v1246_v18 }
 0x507   : > { %v1241_v19 = vpop.f32.mrf.mxu2 }
 0x508   : > { %v1242_v20 = vadd.f32 %v1575_v13, %v1241_v19 }
 0x50a   : > { %v1245_v21 = vadd.f32 %v1242_v20, %v1148_v63 }
 0x50c   : > { %v1249_v22 = vsel %vm1001_vm3, %v1245_v21, 0.0 }
 0x50d   : > { %1250 = vadd.xlane.f32.xlu1 %v1249_v22 }
 0x578   : > { %v1248_v23 = vpop.xlane.xlu2 %1247 }
 0x579   : > { %v1252_v7 = vmul.f32 %v1248_v23, %v1930_v17 }
 0x57b   : > { %v1254_v24 = vsub.f32 %v1244_v16, %v1252_v7 }
 0x57d   : > { %v1256_v25 = vmul.f32 %v1254_v24, %v1254_v24 }
 0x57f   : > { %v1258_v26 = vsel %vm723_vm0, %v1256_v25, 0.0 }
 0x580   : > { %v1251_v11 = vpop.xlane.xlu1 %1250  ;;  %1259 = vadd.xlane.f32.xlu1 %v1258_v26 }
 0x581   : > { %v1253_v27 = vmul.f32 %v1251_v11, %v1930_v17 }
 0x583   : > { %v1255_v28 = vsub.f32 %v1245_v21, %v1253_v27 }
 0x585   : > { %v1257_v29 = vmul.f32 %v1255_v28, %v1255_v28 }
 0x587   : > { %v1261_v31 = vsel %vm1001_vm3, %v1257_v29, 0.0 }
 0x588   : > { %1262 = vadd.xlane.f32.xlu0 %v1261_v31 }
 0x5f3   : > { %v1260_v32 = vpop.xlane.xlu1 %1259 }
 0x5f4   : > { %v1264_v33 = vmul.f32 %v1260_v32, %v1930_v17 }
 0x5f6   : > { %v1266_v34 = vadd.f32 1e-05, %v1264_v33 }
 0x5f8   : > { %1602 = vrsqrt.f32 %v1266_v34  ;;  %vm1274_vm1 = vweird.f32 %v1266_v34 }
 0x5fb   : > { %v1263_v35 = vpop.xlane.xlu0 %1262 }
 0x5fc   : > { %v1265_v36 = vmul.f32 %v1263_v35, %v1930_v17 }
 0x5fe   : > { %v1603_v37 = vpop.eup %1602  ;;  %v1267_v38 = vadd.f32 1e-05, %v1265_v36 }
 0x5ff   : > { %v1269_v39 = vmul.f32 %v1603_v37, %v1266_v34  ;;  %vm1275_vm15 = vweird.f32 %v1603_v37 }
 0x600   : > { %1604 = vrsqrt.f32 %v1267_v38  ;;  %vm1276_vm2 = vmor %vm1274_vm1, %vm1275_vm15  ;;  %vm1284_vm5 = vweird.f32 %v1267_v38 }
 0x601   : > { %v1270_v40 = vmul.f32 %v1603_v37, %v1269_v39 }
 0x603   : > { %v1271_v41 = vmul.f32 0.5, %v1270_v40 }
 0x605   : > { %v1272_v43 = vsub.f32 1.5, %v1271_v41 }
 0x606   : > { %v1605_v44 = vpop.eup %1604 }
 0x607   : > { %v1273_v45 = vmul.f32 %v1603_v37, %v1272_v43  ;;  %v1279_v46 = vmul.f32 %v1605_v44, %v1267_v38  ;;  %vm1285_vm4 = vweird.f32 %v1605_v44 }
 0x608   : > { %vm1286_vm6 = vmor %vm1284_vm5, %vm1285_vm4 }
 0x609   : > { %v1277_v17 = vsel %vm1276_vm2, %v1603_v37, %v1273_v45  ;;  %v1280_v48 = vmul.f32 %v1605_v44, %v1279_v46 }
 0x60a   : > { %v1288_v49 = vmul.f32 %v1277_v17, %v1254_v24 }
 0x60b   : > { %v1281_v51 = vmul.f32 0.5, %v1280_v48 }
 0x60c   : > { %v1294_v52 = vmul.f32 %v1576_v47, %v1288_v49 }
 0x60d   : > { %v1282_v53 = vsub.f32 1.5, %v1281_v51 }
 0x60e   : > { %v1300_v54 = vadd.f32 %v1577_v50, %v1294_v52 }
 0x60f   : > { %v1283_v55 = vmul.f32 %v1605_v44, %v1282_v53 }
 0x610   : > { %1302 = vst.msk [vmem:[%s692_s23] sm:$0xff] %vm723_vm0, %v1300_v54 }
 0x611   : > { %v1287_v30 = vsel %vm1286_vm6, %v1605_v44, %v1283_v55 }
 0x612   : > { %v1289_v56 = vmul.f32 %v1287_v30, %v1255_v28 }
 0x614   : > { %v1295_v57 = vmul.f32 %v1576_v47, %v1289_v56 }
 0x616   : > { %v1301_v58 = vadd.f32 %v1577_v50, %v1295_v57 }
 0x618   : > { %1303 = vst.msk [vmem:[%s677_s24] sm:$0x1] %vm1001_vm3, %v1301_v58 }
 0x619   : > { %1633 = shalt.err (!%p1630_p3)
}
 0x61a   : > { %1528 = dma.vmem_to_hbm [thread:$0]  (%p1819_p5), %s1323_s4, 16, %s1325_s21, %s1309_s26  }
 0x61b PF: > { %s2083_s0 = sld [smem:[#allocation7_spill]] }
 0x61c   : > { %s2084_s22 = sld [smem:[#allocation5_spill]] }
 0x621   : > { %p1534_p4 = scmp.ge.s32.totalorder %s2083_s0, 2 }
 0x622   : > { %s1343_s6 = sand.u32 1, %s2084_s22  }
 0x623   : > { %p1531_p7 = pnand %p1534_p4, %p1823_p6  ;;  %s1344_s3 = scalar_lea.sflag [#allocation3], %s1343_s6 }
 0x625   : > { %p1532_p8 = pneg %p1531_p7 }
 0x627   : > { %1651 = dma.done.wait (%p1532_p8), %s1344_s3, 16  }
 0x628   : > { %1653 = vsyncadd (%p1532_p8), %s1344_s3, 4294967280  ;;  %s2086_s27 = sld [smem:[#allocation8_spill]]  ;;  %s2089_s2 = smov %s1660_s25 }
 0x629   : > { %s2087_s1 = sld [smem:[#allocation6_spill]] }
 0x62a   : > { %s2088_s26 = sld [smem:[#allocation9_spill]] }
 0x62e   : > { %p32_p9 = scmp.ge.s32.totalorder %s2086_s27, 4  }
 0x62f   : > { %s2090_s25 = smov %s2087_s1 }
 0x630   :  { %34 = sbr.rel (!%p32_p9) target bundleno = 12 (0xc), region = 153 }
 0x635   :  { %1349 = vsyncpa [#allocation3], 1 }
 0x636   :  { %1351 = vsyncpa [#allocation3 + $0x1], 1 }

</bundles_post_ra>
